<compile_context>
chip_gen: v6e
topology: v6e:2x2x1
jax: 0.10.0
libtpu: 0.0.40
codegen_flags: <defaults>
</compile_context>

<pallas_src>
import functools

import numpy as np
import jax
import jax.numpy as jnp
from jax.experimental import pallas as pl
from jax.experimental.pallas import tpu as pltpu

_VMEM_LIMIT = 48 * 1024 * 1024      # > v5e/v6e scoped defaults, < v7x physical
_BLOCK_BUDGET = 6 * 1024 * 1024     # target bytes for the main input block


def _pick_tile_rows(n_rows, bytes_per_out_row, cap):
    """Largest divisor of n_rows s.t. the input block stays within budget/cap."""
    by_budget = max(1, _BLOCK_BUDGET // max(1, bytes_per_out_row))
    cap = max(1, min(n_rows, cap, by_budget))
    for d in range(cap, 0, -1):
        if n_rows % d == 0:
            return d
    return 1


# ---------------------------------------------------------------------------
# with_conv=True : 3x3 / stride-2 conv over the (right/bottom zero-padded) input
# ---------------------------------------------------------------------------
def _conv_down_kernel(xm_ref, xh_ref, w01_ref, w2_ref, b_ref, o_ref,
                      *, th, Wo, Cin, Cout):
    # xm_ref : (1, th, 2, Wp, 2*Cin)  main super-rows of this tile
    # xh_ref : (1, 1, 2, Wp, 2*Cin)   halo: first super-row of the next tile
    # w01_ref: (3, 2*Cin, Cout)       [w[kh,0]; w[kh,1]] stacked along Cin
    # w2_ref : (3, Cin, Cout)         w[kh,2]
    # b_ref  : (1, Cout)
    # o_ref  : (1, th, Wo, Cout)
    Wp = xm_ref.shape[3]

    xm = xm_ref[0]                       # (th, 2, Wp, 2C)
    a0 = xm[:, 0]                        # rows 2*oh       (th, Wp, 2C)
    a1 = xm[:, 1]                        # rows 2*oh + 1
    halo = xh_ref[0][:, 0]               # (1, Wp, 2C)     row 2*(R+th)
    if th > 1:
        a2 = jnp.concatenate([a0[1:], halo], axis=0)   # rows 2*oh + 2
    else:
        a2 = halo

    # Bias folded into the accumulator init (no epilogue add).
    bias = b_ref[...].astype(jnp.float32)[None]                  # (1, 1, Cout)
    acc = jnp.broadcast_to(bias, (th, Wo, Cout))

    for kh, ak in enumerate((a0, a1, a2)):
        flat = ak.reshape(th * Wp, 2 * Cin)          # free view (Wp % 8 == 0)
        # kw = 0,1 folded into one K = 2*Cin contraction.
        p01 = jnp.dot(flat, w01_ref[kh], preferred_element_type=jnp.float32)
        # kw = 2 uses the even-column half only (K = Cin).
        p2 = jnp.dot(flat[:, :Cin], w2_ref[kh], preferred_element_type=jnp.float32)
        p01 = p01.reshape(th, Wp, Cout)              # free view
        p2 = p2.reshape(th, Wp, Cout)
        # kw=0/1 contribution sits at super-col q = ow; kw=2 at q = ow + 1.
        acc = acc + p01[:, :Wo, :] + p2[:, 1:Wo + 1, :]

    o_ref[...] = acc[None].astype(o_ref.dtype)


def _downsample_conv_nhwc(x, weight_oihw, bias, *, max_tile_rows=32):
    N, H, W, C = x.shape
    assert H % 2 == 0 and W % 2 == 0, "even spatial dims assumed (as in movqgan)"
    Cout, Cin = weight_oihw.shape[0], weight_oihw.shape[1]
    assert Cin == C
    Ho, Wo = H // 2, W // 2
    Wp = ((Wo + 1 + 7) // 8) * 8         # padded super-col count, multiple of 8
    itemsize = jnp.dtype(x.dtype).itemsize

    # Zero pad: +2 rows bottom, (2*Wp - W) cols right.  Column W / row H are
    # torch's F.pad zeros; the extra cols/rows are only multiplied by discarded
    # results or never read with nonzero weights.
    xp = jnp.pad(x, ((0, 0), (0, 2), (0, 2 * Wp - W), (0, 0)))
    # Layout-preserving fold: rows -> (super-row, phase),
    # columns -> (super-col, even/odd folded into lanes).
    xr = xp.reshape(N, Ho + 1, 2, Wp, 2 * C)

    w_hwio = jnp.transpose(weight_oihw, (2, 3, 1, 0))            # (3, 3, Cin, Cout)
    w01 = jnp.concatenate([w_hwio[:, 0], w_hwio[:, 1]], axis=1)  # (3, 2*Cin, Cout)
    w2 = w_hwio[:, 2]                                            # (3, Cin, Cout)
    b2 = bias.reshape(1, Cout)

    th = _pick_tile_rows(Ho, 2 * Wp * 2 * C * itemsize, max_tile_rows)
    grid = (N, Ho // th)

    kern = functools.partial(_conv_down_kernel, th=th, Wo=Wo, Cin=C, Cout=Cout)
    y = pl.pallas_call(
        kern,
        out_shape=jax.ShapeDtypeStruct((N, Ho, Wo, Cout), x.dtype),
        grid=grid,
        in_specs=[
            # main tile: super-rows [r*th, (r+1)*th)
            pl.BlockSpec((1, th, 2, Wp, 2 * C), lambda n, r: (n, r, 0, 0, 0)),
            # 1-super-row halo at (r+1)*th (block size 1 => block index == element)
            pl.BlockSpec((1, 1, 2, Wp, 2 * C),
                         lambda n, r: (n, (r + 1) * th, 0, 0, 0)),
            pl.BlockSpec((3, 2 * C, Cout), lambda n, r: (0, 0, 0)),
            pl.BlockSpec((3, C, Cout), lambda n, r: (0, 0, 0)),
            pl.BlockSpec((1, Cout), lambda n, r: (0, 0)),
        ],
        out_specs=pl.BlockSpec((1, th, Wo, Cout), lambda n, r: (n, r, 0, 0)),
        compiler_params=pltpu.CompilerParams(
            dimension_semantics=("parallel", "parallel"),
            vmem_limit_bytes=_VMEM_LIMIT),
    )(xr, xr, w01, w2, b2)
    return y


# ---------------------------------------------------------------------------
# with_conv=False : 2x2 / stride-2 average pool
# ---------------------------------------------------------------------------
def _avgpool_kernel(x_ref, o_ref, *, C):
    xb = x_ref[0].astype(jnp.float32)                 # (2*th, Wo, 2*C)
    th = xb.shape[0] // 2
    rows = xb.reshape(th, 2, xb.shape[1], xb.shape[2])   # free view (outer split)
    rsum = rows[:, 0] + rows[:, 1]                    # vertical pair
    psum = rsum[:, :, :C] + rsum[:, :, C:]            # horizontal pair (lane slices)
    o_ref[...] = (psum * 0.25)[None].astype(o_ref.dtype)


def _downsample_avgpool_nhwc(x, *, max_tile_rows=64):
    N, H, W, C = x.shape
    assert H % 2 == 0 and W % 2 == 0
    Ho, Wo = H // 2, W // 2
    itemsize = jnp.dtype(x.dtype).itemsize
    x2 = x.reshape(N, H, Wo, 2 * C)                   # column fold into lanes

    th = _pick_tile_rows(Ho, 2 * Wo * 2 * C * itemsize, max_tile_rows)
    grid = (N, Ho // th)

    kern = functools.partial(_avgpool_kernel, C=C)
    y = pl.pallas_call(
        kern,
        out_shape=jax.ShapeDtypeStruct((N, Ho, Wo, C), x.dtype),
        grid=grid,
        in_specs=[pl.BlockSpec((1, 2 * th, Wo, 2 * C), lambda n, r: (n, r, 0, 0))],
        out_specs=pl.BlockSpec((1, th, Wo, C), lambda n, r: (n, r, 0, 0)),
        compiler_params=pltpu.CompilerParams(
            dimension_semantics=("parallel", "parallel"),
            vmem_limit_bytes=_VMEM_LIMIT),
    )(x2)
    return y


# ---------------------------------------------------------------------------
# Module-equivalent wrappers
# ---------------------------------------------------------------------------
def downsample_nhwc(x_nhwc, with_conv, weight=None, bias=None, *, max_tile_rows=32):
    """NHWC entry point (preferred: avoids two full-HBM transposes)."""
    if with_conv:
        return _downsample_conv_nhwc(x_nhwc, weight, bias, max_tile_rows=max_tile_rows)
    return _downsample_avgpool_nhwc(x_nhwc, max_tile_rows=max_tile_rows)


def downsample(x_nchw, with_conv, weight=None, bias=None, *, max_tile_rows=32):
    """NCHW wrapper matching the PyTorch module interface."""
    x = jnp.transpose(x_nchw, (0, 2, 3, 1))           # NCHW -> NHWC
    y = downsample_nhwc(x, with_conv, weight, bias, max_tile_rows=max_tile_rows)
    return jnp.transpose(y, (0, 3, 1, 2))             # NHWC -> NCHW


if __name__ == "__main__":
    key = jax.random.PRNGKey(0)
    k_x, k_w, k_b = jax.random.split(key, 3)

    N, C, H, W = 2, 4, 16, 16
    x = jax.random.normal(k_x, (N, C, H, W), jnp.float32)

    # Deterministic Conv2d(C, C, kernel_size=3) parameters.
    fan_in = C * 3 * 3
    bound = 1.0 / np.sqrt(fan_in)
    weight = jax.random.uniform(k_w, (C, C, 3, 3), jnp.float32, -bound, bound)
    bias = jax.random.uniform(k_b, (C,), jnp.float32, -bound, bound)

    # max_tile_rows=4 forces a 2-tile spatial grid (exercises halo + tiling path).
    y_conv = downsample(x, with_conv=True, weight=weight, bias=bias, max_tile_rows=4)
    y_pool = downsample(x, with_conv=False, max_tile_rows=4)
    jax.block_until_ready((y_conv, y_pool))

    # Plain-XLA references to validate semantics.
    xp = jnp.pad(x, ((0, 0), (0, 0), (0, 1), (0, 1)))          # F.pad(x, (0,1,0,1))
    ref_conv = jax.lax.conv_general_dilated(
        xp, weight, window_strides=(2, 2), padding="VALID",
        dimension_numbers=("NCHW", "OIHW", "NCHW")) + bias[None, :, None, None]
    ref_pool = x.reshape(N, C, H // 2, 2, W // 2, 2).mean(axis=(3, 5))

    assert y_conv.shape == (N, C, H // 2, W // 2)
    assert y_pool.shape == (N, C, H // 2, W // 2)
    np.testing.assert_allclose(np.asarray(y_conv), np.asarray(ref_conv),
                               rtol=1e-5, atol=1e-5)
    np.testing.assert_allclose(np.asarray(y_pool), np.asarray(ref_pool),
                               rtol=1e-6, atol=1e-6)
    print("KERNEL_OK")
</pallas_src>

<mosaic_0001>
module attributes {stable_mosaic.version = 11 : i64} {
  func.func @_conv_down_kernel(%arg0: i32, %arg1: i32, %arg2: memref<1x4x2x16x8xf32, #tpu.memory_space<vmem>>, %arg3: memref<1x1x2x16x8xf32, #tpu.memory_space<vmem>>, %arg4: memref<3x8x4xf32, #tpu.memory_space<vmem>>, %arg5: memref<3x4x4xf32, #tpu.memory_space<vmem>>, %arg6: memref<1x4xf32, #tpu.memory_space<vmem>>, %arg7: memref<1x4x8x4xf32, #tpu.memory_space<vmem>>) attributes {dimension_semantics = [#tpu.dimension_semantics<parallel>, #tpu.dimension_semantics<parallel>], iteration_bounds = array<i64: 2, 2>, scalar_prefetch = 0 : i64, scratch_operands = 0 : i64, tpu.core_type = #tpu.core_type<tc>, window_params = [{transform_indices = @transform_0, window_bounds = array<i64: 1, 4, 2, 16, 8>}, {transform_indices = @transform_1, window_bounds = array<i64: 1, 1, 2, 16, 8>}, {pipeline_mode = #tpu.pipeline_mode<synchronous>, transform_indices = @transform_2, window_bounds = array<i64: 3, 8, 4>}, {pipeline_mode = #tpu.pipeline_mode<synchronous>, transform_indices = @transform_3, window_bounds = array<i64: 3, 4, 4>}, {pipeline_mode = #tpu.pipeline_mode<synchronous>, transform_indices = @transform_4, window_bounds = array<i64: 1, 4>}, {transform_indices = @transform_5, window_bounds = array<i64: 1, 4, 8, 4>}]} {
    %c0 = arith.constant 0 : index
    %c0_0 = arith.constant 0 : index
    %c0_1 = arith.constant 0 : index
    %c0_2 = arith.constant 0 : index
    %c0_3 = arith.constant 0 : index
    %0 = vector.load %arg2[%c0, %c0_0, %c0_1, %c0_2, %c0_3] : memref<1x4x2x16x8xf32, #tpu.memory_space<vmem>>, vector<1x4x2x16x8xf32>
    %1 = vector.shape_cast %0 : vector<1x4x2x16x8xf32> to vector<4x2x16x8xf32>
    %2 = vector.extract_strided_slice %1 {offsets = [0, 0, 0, 0], sizes = [4, 1, 16, 8], strides = [1, 1, 1, 1]} : vector<4x2x16x8xf32> to vector<4x1x16x8xf32>
    %3 = vector.shape_cast %2 : vector<4x1x16x8xf32> to vector<4x16x8xf32>
    %4 = vector.extract_strided_slice %1 {offsets = [0, 1, 0, 0], sizes = [4, 1, 16, 8], strides = [1, 1, 1, 1]} : vector<4x2x16x8xf32> to vector<4x1x16x8xf32>
    %5 = vector.shape_cast %4 : vector<4x1x16x8xf32> to vector<4x16x8xf32>
    %c0_4 = arith.constant 0 : index
    %c0_5 = arith.constant 0 : index
    %c0_6 = arith.constant 0 : index
    %c0_7 = arith.constant 0 : index
    %c0_8 = arith.constant 0 : index
    %6 = vector.load %arg3[%c0_4, %c0_5, %c0_6, %c0_7, %c0_8] : memref<1x1x2x16x8xf32, #tpu.memory_space<vmem>>, vector<1x1x2x16x8xf32>
    %7 = vector.shape_cast %6 : vector<1x1x2x16x8xf32> to vector<1x2x16x8xf32>
    %8 = vector.extract_strided_slice %7 {offsets = [0, 0, 0, 0], sizes = [1, 1, 16, 8], strides = [1, 1, 1, 1]} : vector<1x2x16x8xf32> to vector<1x1x16x8xf32>
    %9 = vector.shape_cast %8 : vector<1x1x16x8xf32> to vector<1x16x8xf32>
    %10 = vector.extract_strided_slice %3 {offsets = [1, 0, 0], sizes = [3, 16, 8], strides = [1, 1, 1]} : vector<4x16x8xf32> to vector<3x16x8xf32>
    %11 = tpu.concatenate %10, %9 in 0 : vector<3x16x8xf32>, vector<1x16x8xf32> -> vector<4x16x8xf32>
    %c0_9 = arith.constant 0 : index
    %c0_10 = arith.constant 0 : index
    %12 = vector.load %arg6[%c0_9, %c0_10] : memref<1x4xf32, #tpu.memory_space<vmem>>, vector<1x4xf32>
    %13 = vector.shape_cast %12 : vector<1x4xf32> to vector<1x1x4xf32>
    %14 = vector.shape_cast %13 : vector<1x1x4xf32> to vector<1x1x4xf32>
    %15 = vector.broadcast %14 : vector<1x1x4xf32> to vector<4x8x4xf32>
    %16 = vector.shape_cast %3 : vector<4x16x8xf32> to vector<64x8xf32>
    %c0_11 = arith.constant 0 : index
    %c0_12 = arith.constant 0 : index
    %c0_13 = arith.constant 0 : index
    %17 = vector.load %arg4[%c0_11, %c0_12, %c0_13] : memref<3x8x4xf32, #tpu.memory_space<vmem>>, vector<1x8x4xf32>
    %18 = vector.shape_cast %17 : vector<1x8x4xf32> to vector<8x4xf32>
    %cst = arith.constant dense<0.000000e+00> : vector<64x4xf32>
    %19 = tpu.matmul %16, %18, %cst {dimension_numbers = #tpu.dot_dimension_numbers<[1], [0], [0], [1], [0, 0, 1, 1], [], []>} : vector<64x8xf32>, vector<8x4xf32>, vector<64x4xf32> -> vector<64x4xf32>
    %20 = vector.extract_strided_slice %16 {offsets = [0, 0], sizes = [64, 4], strides = [1, 1]} : vector<64x8xf32> to vector<64x4xf32>
    %c0_14 = arith.constant 0 : index
    %c0_15 = arith.constant 0 : index
    %c0_16 = arith.constant 0 : index
    %21 = vector.load %arg5[%c0_14, %c0_15, %c0_16] : memref<3x4x4xf32, #tpu.memory_space<vmem>>, vector<1x4x4xf32>
    %22 = vector.shape_cast %21 : vector<1x4x4xf32> to vector<4x4xf32>
    %cst_17 = arith.constant dense<0.000000e+00> : vector<64x4xf32>
    %23 = tpu.matmul %20, %22, %cst_17 {dimension_numbers = #tpu.dot_dimension_numbers<[1], [0], [0], [1], [0, 0, 1, 1], [], []>} : vector<64x4xf32>, vector<4x4xf32>, vector<64x4xf32> -> vector<64x4xf32>
    %24 = vector.shape_cast %19 : vector<64x4xf32> to vector<4x16x4xf32>
    %25 = vector.shape_cast %23 : vector<64x4xf32> to vector<4x16x4xf32>
    %26 = vector.extract_strided_slice %24 {offsets = [0, 0, 0], sizes = [4, 8, 4], strides = [1, 1, 1]} : vector<4x16x4xf32> to vector<4x8x4xf32>
    %27 = arith.addf %15, %26 : vector<4x8x4xf32>
    %28 = vector.extract_strided_slice %25 {offsets = [0, 1, 0], sizes = [4, 8, 4], strides = [1, 1, 1]} : vector<4x16x4xf32> to vector<4x8x4xf32>
    %29 = arith.addf %27, %28 : vector<4x8x4xf32>
    %30 = vector.shape_cast %5 : vector<4x16x8xf32> to vector<64x8xf32>
    %c1 = arith.constant 1 : index
    %c0_18 = arith.constant 0 : index
    %c0_19 = arith.constant 0 : index
    %31 = vector.load %arg4[%c1, %c0_18, %c0_19] : memref<3x8x4xf32, #tpu.memory_space<vmem>>, vector<1x8x4xf32>
    %32 = vector.shape_cast %31 : vector<1x8x4xf32> to vector<8x4xf32>
    %cst_20 = arith.constant dense<0.000000e+00> : vector<64x4xf32>
    %33 = tpu.matmul %30, %32, %cst_20 {dimension_numbers = #tpu.dot_dimension_numbers<[1], [0], [0], [1], [0, 0, 1, 1], [], []>} : vector<64x8xf32>, vector<8x4xf32>, vector<64x4xf32> -> vector<64x4xf32>
    %34 = vector.extract_strided_slice %30 {offsets = [0, 0], sizes = [64, 4], strides = [1, 1]} : vector<64x8xf32> to vector<64x4xf32>
    %c1_21 = arith.constant 1 : index
    %c0_22 = arith.constant 0 : index
    %c0_23 = arith.constant 0 : index
    %35 = vector.load %arg5[%c1_21, %c0_22, %c0_23] : memref<3x4x4xf32, #tpu.memory_space<vmem>>, vector<1x4x4xf32>
    %36 = vector.shape_cast %35 : vector<1x4x4xf32> to vector<4x4xf32>
    %cst_24 = arith.constant dense<0.000000e+00> : vector<64x4xf32>
    %37 = tpu.matmul %34, %36, %cst_24 {dimension_numbers = #tpu.dot_dimension_numbers<[1], [0], [0], [1], [0, 0, 1, 1], [], []>} : vector<64x4xf32>, vector<4x4xf32>, vector<64x4xf32> -> vector<64x4xf32>
    %38 = vector.shape_cast %33 : vector<64x4xf32> to vector<4x16x4xf32>
    %39 = vector.shape_cast %37 : vector<64x4xf32> to vector<4x16x4xf32>
    %40 = vector.extract_strided_slice %38 {offsets = [0, 0, 0], sizes = [4, 8, 4], strides = [1, 1, 1]} : vector<4x16x4xf32> to vector<4x8x4xf32>
    %41 = arith.addf %29, %40 : vector<4x8x4xf32>
    %42 = vector.extract_strided_slice %39 {offsets = [0, 1, 0], sizes = [4, 8, 4], strides = [1, 1, 1]} : vector<4x16x4xf32> to vector<4x8x4xf32>
    %43 = arith.addf %41, %42 : vector<4x8x4xf32>
    %44 = vector.shape_cast %11 : vector<4x16x8xf32> to vector<64x8xf32>
    %c2 = arith.constant 2 : index
    %c0_25 = arith.constant 0 : index
    %c0_26 = arith.constant 0 : index
    %45 = vector.load %arg4[%c2, %c0_25, %c0_26] : memref<3x8x4xf32, #tpu.memory_space<vmem>>, vector<1x8x4xf32>
    %46 = vector.shape_cast %45 : vector<1x8x4xf32> to vector<8x4xf32>
    %cst_27 = arith.constant dense<0.000000e+00> : vector<64x4xf32>
    %47 = tpu.matmul %44, %46, %cst_27 {dimension_numbers = #tpu.dot_dimension_numbers<[1], [0], [0], [1], [0, 0, 1, 1], [], []>} : vector<64x8xf32>, vector<8x4xf32>, vector<64x4xf32> -> vector<64x4xf32>
    %48 = vector.extract_strided_slice %44 {offsets = [0, 0], sizes = [64, 4], strides = [1, 1]} : vector<64x8xf32> to vector<64x4xf32>
    %c2_28 = arith.constant 2 : index
    %c0_29 = arith.constant 0 : index
    %c0_30 = arith.constant 0 : index
    %49 = vector.load %arg5[%c2_28, %c0_29, %c0_30] : memref<3x4x4xf32, #tpu.memory_space<vmem>>, vector<1x4x4xf32>
    %50 = vector.shape_cast %49 : vector<1x4x4xf32> to vector<4x4xf32>
    %cst_31 = arith.constant dense<0.000000e+00> : vector<64x4xf32>
    %51 = tpu.matmul %48, %50, %cst_31 {dimension_numbers = #tpu.dot_dimension_numbers<[1], [0], [0], [1], [0, 0, 1, 1], [], []>} : vector<64x4xf32>, vector<4x4xf32>, vector<64x4xf32> -> vector<64x4xf32>
    %52 = vector.shape_cast %47 : vector<64x4xf32> to vector<4x16x4xf32>
    %53 = vector.shape_cast %51 : vector<64x4xf32> to vector<4x16x4xf32>
    %54 = vector.extract_strided_slice %52 {offsets = [0, 0, 0], sizes = [4, 8, 4], strides = [1, 1, 1]} : vector<4x16x4xf32> to vector<4x8x4xf32>
    %55 = arith.addf %43, %54 : vector<4x8x4xf32>
    %56 = vector.extract_strided_slice %53 {offsets = [0, 1, 0], sizes = [4, 8, 4], strides = [1, 1, 1]} : vector<4x16x4xf32> to vector<4x8x4xf32>
    %57 = arith.addf %55, %56 : vector<4x8x4xf32>
    %58 = vector.shape_cast %57 : vector<4x8x4xf32> to vector<1x4x8x4xf32>
    %c0_32 = arith.constant 0 : index
    %c0_33 = arith.constant 0 : index
    %c0_34 = arith.constant 0 : index
    %c0_35 = arith.constant 0 : index
    %59 = vector.load %arg7[%c0_32, %c0_33, %c0_34, %c0_35] : memref<1x4x8x4xf32, #tpu.memory_space<vmem>>, vector<1x4x8x4xf32>
    tpu.vector_store %arg7[%c0_32, %c0_33, %c0_34, %c0_35], %58 {strides = array<i32>} : memref<1x4x8x4xf32, #tpu.memory_space<vmem>>, vector<1x4x8x4xf32>,
    return
  }
  func.func @transform_0(%arg0: i32, %arg1: i32) -> (i32, i32, i32, i32, i32) {
    %c0_i32 = arith.constant 0 : i32
    %c0_i32_0 = arith.constant 0 : i32
    %c0_i32_1 = arith.constant 0 : i32
    %c0_i32_2 = arith.constant 0 : i32
    return %arg0, %arg1, %c0_i32, %c0_i32_0, %c0_i32_1 : i32, i32, i32, i32, i32
  }
  func.func @transform_1(%arg0: i32, %arg1: i32) -> (i32, i32, i32, i32, i32) {
    %c1_i32 = arith.constant 1 : i32
    %0 = arith.addi %arg1, %c1_i32 : i32
    %c4_i32 = arith.constant 4 : i32
    %1 = arith.muli %0, %c4_i32 : i32
    %c0_i32 = arith.constant 0 : i32
    %c0_i32_0 = arith.constant 0 : i32
    %c0_i32_1 = arith.constant 0 : i32
    %c0_i32_2 = arith.constant 0 : i32
    return %arg0, %1, %c0_i32, %c0_i32_0, %c0_i32_1 : i32, i32, i32, i32, i32
  }
  func.func @transform_2(%arg0: i32, %arg1: i32) -> (i32, i32, i32) {
    %c0_i32 = arith.constant 0 : i32
    %c0_i32_0 = arith.constant 0 : i32
    %c0_i32_1 = arith.constant 0 : i32
    %c0_i32_2 = arith.constant 0 : i32
    return %c0_i32, %c0_i32_0, %c0_i32_1 : i32, i32, i32
  }
  func.func @transform_3(%arg0: i32, %arg1: i32) -> (i32, i32, i32) {
    %c0_i32 = arith.constant 0 : i32
    %c0_i32_0 = arith.constant 0 : i32
    %c0_i32_1 = arith.constant 0 : i32
    %c0_i32_2 = arith.constant 0 : i32
    return %c0_i32, %c0_i32_0, %c0_i32_1 : i32, i32, i32
  }
  func.func @transform_4(%arg0: i32, %arg1: i32) -> (i32, i32) {
    %c0_i32 = arith.constant 0 : i32
    %c0_i32_0 = arith.constant 0 : i32
    %c0_i32_1 = arith.constant 0 : i32
    return %c0_i32, %c0_i32_0 : i32, i32
  }
  func.func @transform_5(%arg0: i32, %arg1: i32) -> (i32, i32, i32, i32) {
    %c0_i32 = arith.constant 0 : i32
    %c0_i32_0 = arith.constant 0 : i32
    %c0_i32_1 = arith.constant 0 : i32
    return %arg0, %arg1, %c0_i32, %c0_i32_0 : i32, i32, i32, i32
  }
}

</mosaic_0001>

<bundles_post_ra>
// kernel: tpu_custom_call.1
= control target key start
LH: loop header
LB: loop body
LE: loop exit
PB: predicated region body
PF: predicated region fallthrough
CT: control target
= control target key end

     0   :  { %s1644_s18 = smov 0   ;;  %s1646_s19 = smov 0   ;;  %s1831_s0 = inlined_call_operand.vmem [shape: f32[2,9,2,16,8], index: 0, kind: input, shape index: {}]   ;;  %s1832_s1 = inlined_call_operand.vmem [shape: f32[2,9,2,16,8], index: 1, kind: input, shape index: {}]   ;;  %s1833_s2 = inlined_call_operand.vmem [shape: f32[3,8,4], index: 2, kind: input, shape index: {}]   ;;  %s1834_s3 = inlined_call_operand.vmem [shape: f32[3,4,4], index: 3, kind: input, shape index: {}]   ;;  %s1835_s4 = inlined_call_operand.vmem [shape: f32[1,4], index: 4, kind: input, shape index: {}]   ;;  %s1836_s5 = inlined_call_operand.vmem [shape: f32[2,8,8,4], index: 5, kind: output, shape index: {}]  }
   0x1   :  { %s1648_s20 = smov 0   ;;  %s1650_s21 = smov 0  }
   0x2   :  { %s1652_s22 = smov 0  }
   0x3 LB: > { %s24_s23 = sadd.s32 1, %s1604_s20  ;;  %s27_s24 = sadd.s32 1, %s1608_s21  ;;  %s1612_s22 = sphi %s1652_s22, %s15_s22   ;;  %s1608_s21 = sphi %s1650_s21, %s1840_s21   ;;  %s1604_s20 = sphi %s1648_s20, %s1839_s20   ;;  %s1600_s19 = sphi %s1646_s19, %s1838_s19   ;;  %s1596_s18 = sphi %s1644_s18, %s1837_s18  }
   0x4   : > { %p25_p0 = scmp.ge.s32.totalorder %s24_s23, 2  ;;  %p1321_p1 = scmp.ge.s32.totalorder %s1612_s22, 1 }
   0x5   : > { %p245_p2 = scmp.lt.s32.totalorder %s1612_s22, 5 }
   0x6   : > { %s1842_s23 = smov (%p25_p0, %s24_s23), 0  ;;  %s1844_s24 = smov (!%p25_p0, %s27_s24), %s1608_s21 }
   0x7   : > { %p246_p3 = pnand %p1321_p1, %p245_p2  ;;  %p29_p4 = scmp.ge.s32.totalorder %s1844_s24, 2 }
   0x8   : > { %s1680_s29 = sshll.u32 (!%p246_p3), %s1596_s18, 2  ;;  %p306_p5 = scmp.lt.s32.totalorder (!%p246_p3), %s1600_s19, 1 }
   0x9   : > { %s1846_s24 = smov (%p29_p4, %s1844_s24), 0  ;;  %249 = sbr.rel (%p246_p3) target bundleno = 269 (0x10d), region = 40 }
   0xa   : > { %p308_p6 = scmp.lt.s32.totalorder (!%p246_p3), %s1680_s29, 8  ;;  %s1394_s27 = sadd.s32 (!%p246_p3), 4, %s1680_s29 }
   0xb   : > { %p326_p7 = scmp.lt.s32.totalorder (!%p246_p3), %s1394_s27, 8  ;;  %p338_p8 = scmp.lt.s32.totalorder (!%p246_p3), %s1680_s29, 7 }
   0xe   : > { %v497_v0 = vld [vmem:[%s1834_s3] sm:$0xf]  ;;  %vm515_vm0 = vcmask 1043456   ;;  %v1358_v2 = vld [vmem:[%s1834_s3 + $0x4] sm:$0xf]  ;;  %v1349_v3 = vld [vmem:[%s1833_s2 + $0x8] sm:$0xff] }
   0xf   : > { %v370_v1 = vld [vmem:[%s1833_s2] sm:$0xff]  ;;  %1463 = vmatprep.subr.msk.mxu1 %vm515_vm0, %v497_v0  ;;  %s1848_s19 = smov (!%p306_p5, %s1600_s19), 1  ;;  %vm371_vm1 = vcmask 64512   ;;  %vm498_vm2 = vcmask 31744   ;;  %v1377_v7 = vld [vmem:[%s1834_s3 + $0x8] sm:$0xf] }
  0x10   : > { %1449 = vmatprep.subr.mxu0 %v370_v1  ;;  %1464 = vmatpush3.msk.msra.mxu1 %vm515_vm0, %v497_v0  ;;  %s309_s9 = scalar_select %p308_p6, %s1680_s29, 8  ;;  %v1368_v8 = vld [vmem:[%s1833_s2 + $0x10] sm:$0xff]  ;;  %v1331_v44 = vld [vmem:[%s1835_s4] ss:$0 sm:$0xff]  ;;  %vm636_vm3 = vcmask 1046528  }
  0x11   : > { %1450 = vmatpush3.msra.mxu0 %v370_v1  ;;  %1491 = vmatprep.subr.msk.mxu1 %vm515_vm0, %v1358_v2  ;;  %s1533_s10 = smul.u32 36, %s1848_s19  ;;  %s1850_s27 = smov (!%p326_p7, %s1394_s27), 8 }
  0x12   : > { %1477 = vmatprep.subr.mxu0 %v1349_v3  ;;  %s1323_s11 = sshll.u32 %s309_s9, 2  ;;  %s1326_s28 = sshll.u32 %s1850_s27, 2 }
  0x13   : > { %s312_s12 = sadd.s32 %s1533_s10, %s1323_s11  ;;  %s330_s30 = sadd.s32 %s1533_s10, %s1326_s28 }
  0x14   : > { %s1324_s13 = sshll.u32 %s312_s12, 3  ;;  %s1327_s6 = sshll.u32 %s330_s30, 3 }
  0x15   : > { %s1701_s16 = scalar_lea.vmem %s1831_s0, %s1324_s13  ;;  %s332_s9 = scalar_lea.vmem %s1832_s1, %s1327_s6 }
  0x16   : > { %v345_v4 = vld [vmem:[%s1701_s16] sm:$0xff]  ;;  %v346_v5 = vld [vmem:[%s1701_s16 + $0x8] sm:$0xff]  ;;  %v347_v14 = vld [vmem:[%s1701_s16 + $0x10] sm:$0xff]  ;;  %s1852_s29 = smov (!%p338_p8, %s1680_s29), 7  ;;  %s1329_s12 = sshll.u32 %s1848_s19, 3 }
  0x17   : > { %1451 = vmatprep.mubr.msk.f32.mxu0 %vm371_vm1, %v345_v4  ;;  %1465 = vmatprep.mubr.msk.f32.mxu1 %vm498_vm2, %v345_v4  ;;  %v349_v6 = vld [vmem:[%s1701_s16 + $0x20] sm:$0xff]  ;;  %v350_v9 = vld [vmem:[%s1701_s16 + $0x28] sm:$0xff]  ;;  %v348_v15 = vld [vmem:[%s1701_s16 + $0x18] sm:$0xff]  ;;  %s341_s13 = sadd.s32 %s1329_s12, %s1852_s29 }
  0x18   : > { %1452 = vmatmul.mubr.msk.f32.vlgmr.msra.gmra.mxu0 %vm371_vm1, %v346_v5  ;;  %1466 = vmatmul.mubr.msk.f32.vlgmr.msra.gmra.mxu1 %vm498_vm2, %v346_v5  ;;  %v353_v10 = vld [vmem:[%s1701_s16 + $0x40] sm:$0xff]  ;;  %v354_v11 = vld [vmem:[%s1701_s16 + $0x48] sm:$0xff]  ;;  %v351_v16 = vld [vmem:[%s1701_s16 + $0x30] sm:$0xff]  ;;  %s1330_s19 = sshll.u32 %s341_s13, 3 }
  0x19   : > { %1492 = vmatpush3.msk.msra.mxu1 %vm515_vm0, %v1358_v2  ;;  %1478 = vmatpush3.msra.mxu0 %v1349_v3  ;;  %v357_v12 = vld [vmem:[%s1701_s16 + $0x60] sm:$0xff]  ;;  %v358_v13 = vld [vmem:[%s1701_s16 + $0x68] sm:$0xff]  ;;  %v352_v17 = vld [vmem:[%s1701_s16 + $0x38] sm:$0xff]  ;;  %s1800_s15 = scalar_lea.vmem %s1836_s5, %s1330_s19 }
  0x1a   : > { %1454 = vmatprep.mubr.msk.f32.mxu0 %vm371_vm1, %v349_v6  ;;  %1468 = vmatprep.mubr.msk.f32.mxu1 %vm498_vm2, %v349_v6  ;;  %v355_v18 = vld [vmem:[%s1701_s16 + $0x50] sm:$0xff]  ;;  %v356_v19 = vld [vmem:[%s1701_s16 + $0x58] sm:$0xff]  ;;  %v361_v22 = vld [vmem:[%s332_s9] sm:$0xff] }
  0x1b   : > { %1519 = vmatprep.subr.msk.mxu1 %vm515_vm0, %v1377_v7  ;;  %1505 = vmatprep.subr.mxu0 %v1368_v8  ;;  %v359_v20 = vld [vmem:[%s1701_s16 + $0x70] sm:$0xff]  ;;  %v360_v21 = vld [vmem:[%s1701_s16 + $0x78] sm:$0xff]  ;;  %v362_v23 = vld [vmem:[%s332_s9 + $0x8] sm:$0xff] }
  0x1c   : > { %1455 = vmatmul.mubr.msk.f32.gmra.mxu0 %vm371_vm1, %v350_v9  ;;  %1469 = vmatmul.mubr.msk.f32.gmra.mxu1 %vm498_vm2, %v350_v9 }
  0x1d   : > { %1457 = vmatprep.mubr.msk.f32.mxu0 %vm371_vm1, %v353_v10  ;;  %1471 = vmatprep.mubr.msk.f32.mxu1 %vm498_vm2, %v353_v10 }
  0x20   : > { %1458 = vmatmul.mubr.msk.f32.gmra.mxu0 %vm371_vm1, %v354_v11  ;;  %1472 = vmatmul.mubr.msk.f32.gmra.mxu1 %vm498_vm2, %v354_v11 }
  0x21   : > { %1460 = vmatprep.mubr.msk.f32.mxu0 %vm371_vm1, %v357_v12  ;;  %1474 = vmatprep.mubr.msk.f32.mxu1 %vm498_vm2, %v357_v12 }
  0x24   : > { %1461 = vmatmul.mubr.msk.f32.gmra.mxu0 %vm371_vm1, %v358_v13  ;;  %1475 = vmatmul.mubr.msk.f32.gmra.mxu1 %vm498_vm2, %v358_v13 }
  0x25   : > { %1479 = vmatprep.mubr.msk.f32.mxu0 %vm371_vm1, %v347_v14  ;;  %1493 = vmatprep.mubr.msk.f32.mxu1 %vm498_vm2, %v347_v14 }
  0x28   : > { %1480 = vmatmul.mubr.msk.f32.vlgmr.msra.gmra.mxu0 %vm371_vm1, %v348_v15  ;;  %1494 = vmatmul.mubr.msk.f32.vlgmr.msra.gmra.mxu1 %vm498_vm2, %v348_v15 }
  0x29   : > { %1520 = vmatpush3.msk.msra.mxu1 %vm515_vm0, %v1377_v7  ;;  %1506 = vmatpush3.msra.mxu0 %v1368_v8 }
  0x2a   : > { %1482 = vmatprep.mubr.msk.f32.mxu0 %vm371_vm1, %v351_v16  ;;  %1496 = vmatprep.mubr.msk.f32.mxu1 %vm498_vm2, %v351_v16 }
  0x2c   : > { %1483 = vmatmul.mubr.msk.f32.gmra.mxu0 %vm371_vm1, %v352_v17  ;;  %1497 = vmatmul.mubr.msk.f32.gmra.mxu1 %vm498_vm2, %v352_v17 }
  0x2d   : > { %1485 = vmatprep.mubr.msk.f32.mxu0 %vm371_vm1, %v355_v18  ;;  %1499 = vmatprep.mubr.msk.f32.mxu1 %vm498_vm2, %v355_v18 }
  0x30   : > { %1486 = vmatmul.mubr.msk.f32.gmra.mxu0 %vm371_vm1, %v356_v19  ;;  %1500 = vmatmul.mubr.msk.f32.gmra.mxu1 %vm498_vm2, %v356_v19 }
  0x31   : > { %1488 = vmatprep.mubr.msk.f32.mxu0 %vm371_vm1, %v359_v20  ;;  %1502 = vmatprep.mubr.msk.f32.mxu1 %vm498_vm2, %v359_v20 }
  0x34   : > { %1489 = vmatmul.mubr.msk.f32.gmra.mxu0 %vm371_vm1, %v360_v21  ;;  %1503 = vmatmul.mubr.msk.f32.gmra.mxu1 %vm498_vm2, %v360_v21 }
  0x35   : > { %1507 = vmatprep.mubr.msk.f32.mxu0 %vm371_vm1, %v349_v6  ;;  %1521 = vmatprep.mubr.msk.f32.mxu1 %vm498_vm2, %v349_v6 }
  0x38   : > { %1508 = vmatmul.mubr.msk.f32.vlgmr.msra.gmra.mxu0 %vm371_vm1, %v350_v9  ;;  %1522 = vmatmul.mubr.msk.f32.vlgmr.msra.gmra.mxu1 %vm498_vm2, %v350_v9 }
  0x39   : > { %1510 = vmatprep.mubr.msk.f32.mxu0 %vm371_vm1, %v353_v10  ;;  %1524 = vmatprep.mubr.msk.f32.mxu1 %vm498_vm2, %v353_v10 }
  0x3c   : > { %1511 = vmatmul.mubr.msk.f32.gmra.mxu0 %vm371_vm1, %v354_v11  ;;  %1525 = vmatmul.mubr.msk.f32.gmra.mxu1 %vm498_vm2, %v354_v11 }
  0x3d   : > { %1513 = vmatprep.mubr.msk.f32.mxu0 %vm371_vm1, %v357_v12  ;;  %1527 = vmatprep.mubr.msk.f32.mxu1 %vm498_vm2, %v357_v12 }
  0x40   : > { %1514 = vmatmul.mubr.msk.f32.gmra.mxu0 %vm371_vm1, %v358_v13  ;;  %1528 = vmatmul.mubr.msk.f32.gmra.mxu1 %vm498_vm2, %v358_v13 }
  0x41   : > { %1516 = vmatprep.mubr.msk.f32.mxu0 %vm371_vm1, %v361_v22  ;;  %1530 = vmatprep.mubr.msk.f32.mxu1 %vm498_vm2, %v361_v22 }
  0x44   : > { %1517 = vmatmul.mubr.msk.f32.gmra.mxu0 %vm371_vm1, %v362_v23  ;;  %1531 = vmatmul.mubr.msk.f32.gmra.mxu1 %vm498_vm2, %v362_v23 }
  0xd8   : > { %v1453_v24 = vpop.f32.mrf.mxu0  ;;  %v1467_v25 = vpop.f32.mrf.mxu1 }
  0xd9   : > { %v638_v48 = vrot.slane %v1467_v25, 1 }
  0xda   : > { %v462_v26 = vpop.f32.mrf.mxu0  ;;  %v585_v27 = vpop.f32.mrf.mxu1 }
  0xdb   : > { %v637_v45 = vrot.slane %v585_v27, 1  ;;  %v624_v51 = vadd.f32 %v1331_v44, %v462_v26 }
  0xdc   : > { %v1456_v28 = vpop.f32.mrf.mxu0  ;;  %v1470_v29 = vpop.f32.mrf.mxu1 }
  0xdd   : > { %v639_v53 = vsel %vm636_vm3, %v637_v45, %v638_v48  ;;  %v641_v56 = vrot.slane %v1470_v29, 1 }
  0xde   : > { %v471_v30 = vpop.f32.mrf.mxu0  ;;  %v595_v31 = vpop.f32.mrf.mxu1  ;;  %v653_v62 = vadd.f32 %v639_v53, %v624_v51 }
  0xdf   : > { %v640_v52 = vrot.slane %v595_v31, 1  ;;  %v625_v60 = vadd.f32 %v1331_v44, %v471_v30 }
  0xe0   : > { %v1459_v32 = vpop.f32.mrf.mxu0  ;;  %v1473_v33 = vpop.f32.mrf.mxu1 }
  0xe1   : > { %v642_v0 = vsel %vm636_vm3, %v640_v52, %v641_v56  ;;  %v644_v3 = vrot.slane %v1473_v33, 1 }
  0xe2   : > { %v480_v34 = vpop.f32.mrf.mxu0  ;;  %v605_v35 = vpop.f32.mrf.mxu1  ;;  %v654_v10 = vadd.f32 %v642_v0, %v625_v60 }
  0xe3   : > { %v643_v61 = vrot.slane %v605_v35, 1  ;;  %v626_v5 = vadd.f32 %v1331_v44, %v480_v34 }
  0xe4   : > { %v1462_v36 = vpop.f32.mrf.mxu0  ;;  %v1782_v37 = vpop.f32.mrf.mxu1 }
  0xe5   : > { %v645_v11 = vsel %vm636_vm3, %v643_v61, %v644_v3  ;;  %v647_v18 = vrot.slane %v1782_v37, 1 }
  0xe6   : > { %v489_v38 = vpop.f32.mrf.mxu0  ;;  %v615_v39 = vpop.f32.mrf.mxu1  ;;  %v655_v19 = vadd.f32 %v645_v11, %v626_v5 }
  0xe7   : > { %v646_v12 = vrot.slane %v615_v39, 1  ;;  %v627_v24 = vadd.f32 %v1331_v44, %v489_v38 }
  0xe8   : > { %v1481_v40 = vpop.f32.mrf.mxu0  ;;  %v1495_v41 = vpop.f32.mrf.mxu1 }
  0xe9   : > { %v923_v63 = vrot.slane %v1495_v41, 1  ;;  %v648_v29 = vsel %vm636_vm3, %v646_v12, %v647_v18 }
  0xea   : > { %v749_v42 = vpop.f32.mrf.mxu0  ;;  %v871_v43 = vpop.f32.mrf.mxu1  ;;  %v656_v40 = vadd.f32 %v648_v29, %v627_v24 }
  0xeb   : > { %v922_v57 = vrot.slane %v871_v43, 1  ;;  %v910_v4 = vadd.f32 %v749_v42, %v653_v62 }
  0xec   : > { %v1484_v46 = vpop.f32.mrf.mxu0  ;;  %v1498_v47 = vpop.f32.mrf.mxu1 }
  0xed   : > { %v924_v9 = vsel %vm636_vm3, %v922_v57, %v923_v63  ;;  %v926_v13 = vrot.slane %v1498_v47, 1 }
  0xee   : > { %v758_v49 = vpop.f32.mrf.mxu0  ;;  %v881_v50 = vpop.f32.mrf.mxu1  ;;  %v938_v17 = vadd.f32 %v924_v9, %v910_v4 }
  0xef   : > { %v925_v6 = vrot.slane %v881_v50, 1  ;;  %v911_v16 = vadd.f32 %v758_v49, %v654_v10 }
  0xf0   : > { %v1487_v54 = vpop.f32.mrf.mxu0  ;;  %v1501_v55 = vpop.f32.mrf.mxu1 }
  0xf1   : > { %v927_v23 = vsel %vm636_vm3, %v925_v6, %v926_v13  ;;  %v929_v28 = vrot.slane %v1501_v55, 1 }
  0xf2   : > { %v767_v58 = vpop.f32.mrf.mxu0  ;;  %v891_v59 = vpop.f32.mrf.mxu1  ;;  %v939_v34 = vadd.f32 %v927_v23, %v911_v16 }
  0xf3   : > { %v928_v20 = vrot.slane %v891_v59, 1  ;;  %v912_v32 = vadd.f32 %v767_v58, %v655_v19 }
  0xf4   : > { %v1490_v1 = vpop.f32.mrf.mxu0  ;;  %v1504_v2 = vpop.f32.mrf.mxu1 }
  0xf5   : > { %v930_v39 = vsel %vm636_vm3, %v928_v20, %v929_v28  ;;  %v932_v44 = vrot.slane %v1504_v2, 1 }
  0xf6   : > { %v776_v7 = vpop.f32.mrf.mxu0  ;;  %v901_v8 = vpop.f32.mrf.mxu1  ;;  %v940_v49 = vadd.f32 %v930_v39, %v912_v32 }
  0xf7   : > { %v931_v35 = vrot.slane %v901_v8, 1  ;;  %v913_v47 = vadd.f32 %v776_v7, %v656_v40 }
  0xf8   : > { %v1509_v14 = vpop.f32.mrf.mxu0  ;;  %v1523_v15 = vpop.f32.mrf.mxu1 }
  0xf9   : > { %v1178_v25 = vrot.slane %v1523_v15, 1  ;;  %v933_v53 = vsel %vm636_vm3, %v931_v35, %v932_v44 }
  0xfa   : > { %v1016_v21 = vpop.f32.mrf.mxu0  ;;  %v1126_v22 = vpop.f32.mrf.mxu1  ;;  %v941_v60 = vadd.f32 %v933_v53, %v913_v47 }
  0xfb   : > { %v1165_v26 = vadd.f32 %v1016_v21, %v938_v17  ;;  %v1177_v27 = vrot.slane %v1126_v22, 1 }
  0xfc   : > { %v1512_v30 = vpop.f32.mrf.mxu0  ;;  %v1526_v31 = vpop.f32.mrf.mxu1 }
  0xfd   : > { %v1179_v33 = vsel %vm636_vm3, %v1177_v27, %v1178_v25  ;;  %v1181_v41 = vrot.slane %v1526_v31, 1 }
  0xfe   : > { %v1193_v36 = vadd.f32 %v1179_v33, %v1165_v26  ;;  %v1025_v37 = vpop.f32.mrf.mxu0  ;;  %v1136_v38 = vpop.f32.mrf.mxu1 }
  0xff   : > { %v1166_v42 = vadd.f32 %v1025_v37, %v939_v34  ;;  %v1180_v43 = vrot.slane %v1136_v38, 1 }
 0x100   : > { %1197 = vst.msk [vmem:[%s1800_s15] sm:$0xff] %vm498_vm2, %v1193_v36  ;;  %v1515_v45 = vpop.f32.mrf.mxu0  ;;  %v1529_v46 = vpop.f32.mrf.mxu1 }
 0x101   : > { %v1182_v48 = vsel %vm636_vm3, %v1180_v43, %v1181_v41  ;;  %v1184_v54 = vrot.slane %v1529_v46, 1 }
 0x102   : > { %v1194_v50 = vadd.f32 %v1182_v48, %v1166_v42  ;;  %v1034_v51 = vpop.f32.mrf.mxu0  ;;  %v1146_v52 = vpop.f32.mrf.mxu1 }
 0x103   : > { %v1167_v55 = vadd.f32 %v1034_v51, %v940_v49  ;;  %v1183_v56 = vrot.slane %v1146_v52, 1 }
 0x104   : > { %1198 = vst.msk [vmem:[%s1800_s15 + $0x8] sm:$0xff] %vm498_vm2, %v1194_v50  ;;  %v1518_v57 = vpop.f32.mrf.mxu0  ;;  %v1532_v58 = vpop.f32.mrf.mxu1 }
 0x105   : > { %v1185_v59 = vsel %vm636_vm3, %v1183_v56, %v1184_v54  ;;  %v1187_v0 = vrot.slane %v1532_v58, 1 }
 0x106   : > { %v1195_v61 = vadd.f32 %v1185_v59, %v1167_v55  ;;  %v1043_v62 = vpop.f32.mrf.mxu0  ;;  %v1156_v63 = vpop.f32.mrf.mxu1 }
 0x107   : > { %v1168_v1 = vadd.f32 %v1043_v62, %v941_v60  ;;  %v1186_v2 = vrot.slane %v1156_v63, 1 }
 0x108   : > { %1199 = vst.msk [vmem:[%s1800_s15 + $0x10] sm:$0xff] %vm498_vm2, %v1195_v61 }
 0x109   : > { %v1188_v3 = vsel %vm636_vm3, %v1186_v2, %v1187_v0 }
 0x10a   : > { %v1196_v4 = vadd.f32 %v1188_v3, %v1168_v1 }
 0x10c   : > { %1200 = vst.msk [vmem:[%s1800_s15 + $0x18] sm:$0xff] %vm498_vm2, %v1196_v4 }
 0x10d PF: > { %s15_s22 = sadd.s32 1, %s1612_s22   ;;  %s1837_s18 = smov %s1604_s20 }
 0x10e   : > { %p12_p9 = scmp.ge.s32.totalorder %s15_s22, 6   ;;  %s1838_s19 = smov %s1608_s21 }
 0x10f   : > { %s1839_s20 = smov %s1842_s23  ;;  %s1840_s21 = smov %s1846_s24 }
 0x110   :  { %14 = sbr.rel (!%p12_p9) target bundleno = 3 (0x3), region = 77 }

</bundles_post_ra>
